<compile_context>
chip_gen: v6e
topology: v6e:2x2x1
jax: 0.10.0
libtpu: 0.0.40
codegen_flags: <defaults>
</compile_context>

<pallas_src>
from functools import partial

import jax
import jax.numpy as jnp
from jax.experimental import pallas as pl
from jax.experimental.pallas import tpu as pltpu


def _round_up(x, m):
    return (x + m - 1) // m * m


def _mean_vfe_kernel(feat_ref, nv_ref, out_ref, *, P, C):
    # feat_ref: (tv, P*C), nv_ref: (tv, 1), out_ref: (tv, C)
    # Unrolled static lane-slice accumulation over the P points (VPU adds).
    acc = feat_ref[:, 0:C].astype(jnp.float32)
    for p in range(1, P):
        acc = acc + feat_ref[:, p * C:(p + 1) * C].astype(jnp.float32)
    # Divide -> EUP approximate reciprocal + VPU multiply (broadcast over C).
    inv_nv = pl.reciprocal(nv_ref[...].astype(jnp.float32), approx=True)
    out_ref[...] = (acc * inv_nv).astype(out_ref.dtype)


def mean_voxel_feature_extractor(features, num_voxels, num_input_features=4, tv=1024):
    """Pallas implementation of MeanVoxelFeatureExtractor.forward."""
    V, P, C = features.shape
    assert C == num_input_features, "num_input_features must match last dim"
    PC = P * C

    # Free row-major reshape: (V, P, C) -> (V, P*C); trailing dim is lane-dense.
    feat2d = features.reshape(V, PC)

    # Tile size along V: multiple of 8 (sublane), no bigger than needed.
    tv = max(8, min(int(tv), _round_up(V, 8)))
    tv = _round_up(tv, 8)
    num_blocks = pl.cdiv(V, tv)
    Vp = num_blocks * tv

    # num_voxels.type_as(features).view(-1, 1); pad the TINY nv array (with 1)
    # so the ragged tail block never divides by zero/garbage.  The big
    # features array is NOT padded -- Pallas handles the ragged last block.
    nv = num_voxels.astype(features.dtype).reshape(V, 1)
    if Vp != V:
        nv = jnp.pad(nv, ((0, Vp - V), (0, 0)), constant_values=1)

    # Rough VMEM budget (double-buffered inputs + output), lane/sublane padded.
    itemsize = jnp.dtype(features.dtype).itemsize

    def _buf_bytes(rows, cols):
        return _round_up(rows, 8) * _round_up(cols, 128) * itemsize

    est = 2 * _buf_bytes(tv, PC) + 2 * _buf_bytes(tv, 1) + 2 * _buf_bytes(tv, C)
    # Generous headroom, but stay well inside v7x's 64 MiB physical VMEM.
    vmem_limit = int(min(48 * 2**20, max(32 * 2**20, 4 * est)))

    kernel = partial(_mean_vfe_kernel, P=P, C=C)

    out = pl.pallas_call(
        kernel,
        out_shape=jax.ShapeDtypeStruct((V, C), features.dtype),
        grid_spec=pltpu.PrefetchScalarGridSpec(
            num_scalar_prefetch=0,
            grid=(num_blocks,),
            in_specs=[
                pl.BlockSpec((tv, PC), lambda i: (i, 0)),
                pl.BlockSpec((tv, 1), lambda i: (i, 0)),
            ],
            out_specs=pl.BlockSpec((tv, C), lambda i: (i, 0)),
        ),
        compiler_params=pltpu.CompilerParams(
            dimension_semantics=("parallel",),
            vmem_limit_bytes=vmem_limit,
        ),
    )(feat2d, nv)

    return out


if __name__ == "__main__":
    key = jax.random.PRNGKey(0)

    # (V, P, C, tv): one even case, one ragged case exercising the tail block.
    cases = [(16, 8, 4, 1024), (300, 8, 4, 64)]

    for (V, P, C, tv) in cases:
        k_feat, k_nv, key = jax.random.split(key, 3)
        features = jax.random.normal(k_feat, (V, P, C), dtype=jnp.float32)
        num_voxels = jax.random.randint(k_nv, (V,), minval=1, maxval=P + 1,
                                        dtype=jnp.int32)

        # Zero out "invalid" points beyond num_voxels, matching typical VFE inputs.
        point_idx = jnp.arange(P)[None, :, None]
        mask = (point_idx < num_voxels[:, None, None]).astype(features.dtype)
        features = features * mask

        out = mean_voxel_feature_extractor(features, num_voxels,
                                           num_input_features=C, tv=tv)
        out = jax.block_until_ready(out)

        # Reference in plain JAX (mirrors the PyTorch forward, exact divide).
        ref = features[:, :, :C].sum(axis=1) / num_voxels.astype(
            features.dtype).reshape(-1, 1)

        assert out.shape == (V, C)
        # Tolerance covers the approximate EUP reciprocal (still far below any
        # real error a wrong reduction/indexing would produce).
        assert jnp.allclose(out, ref, atol=3e-3, rtol=3e-3), (
            f"mismatch for V={V}: max abs err "
            f"{float(jnp.max(jnp.abs(out - ref)))}")

    print("KERNEL_OK")
</pallas_src>

<mosaic_0001>
module attributes {stable_mosaic.version = 11 : i64} {
  func.func @_mean_vfe_kernel(%arg0: i32, %arg1: memref<16x32xf32, #tpu.memory_space<vmem>>, %arg2: memref<16x1xf32, #tpu.memory_space<vmem>>, %arg3: memref<16x4xf32, #tpu.memory_space<vmem>>) attributes {dimension_semantics = [#tpu.dimension_semantics<parallel>], iteration_bounds = array<i64: 1>, scalar_prefetch = 0 : i64, scratch_operands = 0 : i64, tpu.core_type = #tpu.core_type<tc>, window_params = [{transform_indices = @transform_0, window_bounds = array<i64: 16, 32>}, {transform_indices = @transform_1, window_bounds = array<i64: 16, 1>}, {transform_indices = @transform_2, window_bounds = array<i64: 16, 4>}]} {
    %c0 = arith.constant 0 : index
    %c0_0 = arith.constant 0 : index
    %0 = vector.load %arg1[%c0, %c0_0] : memref<16x32xf32, #tpu.memory_space<vmem>>, vector<16x4xf32>
    %c0_1 = arith.constant 0 : index
    %c4 = arith.constant 4 : index
    %1 = vector.load %arg1[%c0_1, %c4] : memref<16x32xf32, #tpu.memory_space<vmem>>, vector<16x4xf32>
    %2 = arith.addf %0, %1 : vector<16x4xf32>
    %c0_2 = arith.constant 0 : index
    %c8 = arith.constant 8 : index
    %3 = vector.load %arg1[%c0_2, %c8] : memref<16x32xf32, #tpu.memory_space<vmem>>, vector<16x4xf32>
    %4 = arith.addf %2, %3 : vector<16x4xf32>
    %c0_3 = arith.constant 0 : index
    %c12 = arith.constant 12 : index
    %5 = vector.load %arg1[%c0_3, %c12] : memref<16x32xf32, #tpu.memory_space<vmem>>, vector<16x4xf32>
    %6 = arith.addf %4, %5 : vector<16x4xf32>
    %c0_4 = arith.constant 0 : index
    %c16 = arith.constant 16 : index
    %7 = vector.load %arg1[%c0_4, %c16] : memref<16x32xf32, #tpu.memory_space<vmem>>, vector<16x4xf32>
    %8 = arith.addf %6, %7 : vector<16x4xf32>
    %c0_5 = arith.constant 0 : index
    %c20 = arith.constant 20 : index
    %9 = vector.load %arg1[%c0_5, %c20] : memref<16x32xf32, #tpu.memory_space<vmem>>, vector<16x4xf32>
    %10 = arith.addf %8, %9 : vector<16x4xf32>
    %c0_6 = arith.constant 0 : index
    %c24 = arith.constant 24 : index
    %11 = vector.load %arg1[%c0_6, %c24] : memref<16x32xf32, #tpu.memory_space<vmem>>, vector<16x4xf32>
    %12 = arith.addf %10, %11 : vector<16x4xf32>
    %c0_7 = arith.constant 0 : index
    %c28 = arith.constant 28 : index
    %13 = vector.load %arg1[%c0_7, %c28] : memref<16x32xf32, #tpu.memory_space<vmem>>, vector<16x4xf32>
    %14 = arith.addf %12, %13 : vector<16x4xf32>
    %c0_8 = arith.constant 0 : index
    %c0_9 = arith.constant 0 : index
    %15 = vector.load %arg2[%c0_8, %c0_9] : memref<16x1xf32, #tpu.memory_space<vmem>>, vector<16x1xf32>
    %16 = tpu.reciprocal %15 {approx = true} : vector<16x1xf32> -> vector<16x1xf32>
    %17 = vector.broadcast %16 : vector<16x1xf32> to vector<16x4xf32>
    %18 = arith.mulf %14, %17 : vector<16x4xf32>
    %c0_10 = arith.constant 0 : index
    %c0_11 = arith.constant 0 : index
    %19 = vector.load %arg3[%c0_10, %c0_11] : memref<16x4xf32, #tpu.memory_space<vmem>>, vector<16x4xf32>
    tpu.vector_store %arg3[%c0_10, %c0_11], %18 {strides = array<i32>} : memref<16x4xf32, #tpu.memory_space<vmem>>, vector<16x4xf32>,
    return
  }
  func.func @transform_0(%arg0: i32) -> (i32, i32) {
    %c0_i32 = arith.constant 0 : i32
    %c0_i32_0 = arith.constant 0 : i32
    return %arg0, %c0_i32 : i32, i32
  }
  func.func @transform_1(%arg0: i32) -> (i32, i32) {
    %c0_i32 = arith.constant 0 : i32
    %c0_i32_0 = arith.constant 0 : i32
    return %arg0, %c0_i32 : i32, i32
  }
  func.func @transform_2(%arg0: i32) -> (i32, i32) {
    %c0_i32 = arith.constant 0 : i32
    %c0_i32_0 = arith.constant 0 : i32
    return %arg0, %c0_i32 : i32, i32
  }
}

</mosaic_0001>

<bundles_post_ra>
// kernel: tpu_custom_call.1
= control target key start
LH: loop header
LB: loop body
LE: loop exit
PB: predicated region body
PF: predicated region fallthrough
CT: control target
= control target key end

     0   :  { %v108_v1 = vmov 0   ;;  %s109_s11 = smov 120   ;;  %s110_s12 = smov 124   ;;  %vm87_vm0 = vcmask 31744   ;;  %s149_s0 = inlined_call_operand.vmem [shape: f32[16,32], index: 0, kind: input, shape index: {}]   ;;  %s150_s1 = inlined_call_operand.vmem [shape: f32[16,1], index: 1, kind: input, shape index: {}]   ;;  %s151_s2 = inlined_call_operand.vmem [shape: f32[16,4], index: 2, kind: output, shape index: {}]  }
   0x1   :  { %v11_v0 = vld [vmem:[%s149_s0] sm:$0xff]  ;;  %103 = vset.pattern.permute.xlu1 %v108_v1  ;;  %102 = vset.pattern.permute.xlu0 %v108_v1  ;;  %v72_v2 = vld [vmem:[%s150_s1 + $0x8] sm:$0xff]  ;;  %s111_s19 = smov 116   ;;  %s112_s20 = smov 112  }
   0x2   :  { %23 = vrot.lane.b32.xlu1 %v11_v0, %s109_s11  ;;  %15 = vrot.lane.b32.xlu0 %v11_v0, %s110_s12  ;;  %v12_v3 = vld [vmem:[%s149_s0 + $0x8] sm:$0xff]  ;;  %v71_v4 = vld [vmem:[%s150_s1] sm:$0xff]  ;;  %104 = vrcp.f32 %v72_v2  ;;  %s113_s21 = smov 108   ;;  %s114_s0 = smov 104  }
   0x3   :  { %106 = vrcp.f32 %v71_v4  ;;  %s115_s1 = smov 100  }
   0x6   :  { %25 = vrot.lane.b32.xlu1 %v12_v3, %s109_s11  ;;  %17 = vrot.lane.b32.xlu0 %v12_v3, %s110_s12 }
   0xa   :  { %33 = vrot.lane.b32.xlu1 %v12_v3, %s111_s19  ;;  %31 = vrot.lane.b32.xlu0 %v11_v0, %s111_s19 }
   0xe   :  { %41 = vrot.lane.b32.xlu1 %v12_v3, %s112_s20  ;;  %39 = vrot.lane.b32.xlu0 %v11_v0, %s112_s20 }
   0xf   :  { %v105_v5 = vpop.eup %104 }
  0x10   :  { %v107_v6 = vpop.eup %106 }
  0x12   :  { %49 = vrot.lane.b32.xlu1 %v12_v3, %s113_s21  ;;  %47 = vrot.lane.b32.xlu0 %v11_v0, %s113_s21 }
  0x16   :  { %82 = vperm.xlu1 %103, %v105_v5   ;;  %77 = vperm.xlu0 %102, %v107_v6  }
  0x1a   :  { %55 = vrot.lane.b32.xlu1 %v11_v0, %s114_s0  ;;  %57 = vrot.lane.b32.xlu0 %v12_v3, %s114_s0 }
  0x1e   :  { %63 = vrot.lane.b32.xlu1 %v11_v0, %s115_s1  ;;  %65 = vrot.lane.b32.xlu0 %v12_v3, %s115_s1 }
  0x74   :  { %v24_v7 = vpop.permute.xlu1 %23  ;;  %v16_v8 = vpop.permute.xlu0 %15 }
  0x75   :  { %v21_v16 = vadd.f32 %v16_v8, %v11_v0 }
  0x77   :  { %v29_v20 = vadd.f32 %v24_v7, %v21_v16 }
  0x78   :  { %v26_v9 = vpop.permute.xlu1 %25  ;;  %v18_v10 = vpop.permute.xlu0 %17 }
  0x79   :  { %v22_v15 = vadd.f32 %v18_v10, %v12_v3 }
  0x7b   :  { %v30_v19 = vadd.f32 %v26_v9, %v22_v15 }
  0x7c   :  { %v34_v11 = vpop.permute.xlu1 %33  ;;  %v32_v12 = vpop.permute.xlu0 %31 }
  0x7d   :  { %v38_v23 = vadd.f32 %v34_v11, %v30_v19  ;;  %v37_v24 = vadd.f32 %v32_v12, %v29_v20 }
  0x80   :  { %v42_v13 = vpop.permute.xlu1 %41  ;;  %v40_v14 = vpop.permute.xlu0 %39 }
  0x81   :  { %v46_v25 = vadd.f32 %v42_v13, %v38_v23  ;;  %v45_v26 = vadd.f32 %v40_v14, %v37_v24 }
  0x84   :  { %v50_v17 = vpop.permute.xlu1 %49  ;;  %v48_v18 = vpop.permute.xlu0 %47 }
  0x85   :  { %v54_v29 = vadd.f32 %v50_v17, %v46_v25  ;;  %v53_v30 = vadd.f32 %v48_v18, %v45_v26 }
  0x91   :  { %v83_v21 = vpop.permute.xlu1 %82  ;;  %v78_v22 = vpop.permute.xlu0 %77 }
  0x95   :  { %v56_v27 = vpop.permute.xlu1 %55  ;;  %v58_v28 = vpop.permute.xlu0 %57 }
  0x96   :  { %v61_v31 = vadd.f32 %v56_v27, %v53_v30  ;;  %v62_v32 = vadd.f32 %v58_v28, %v54_v29 }
  0x99   :  { %v64_v33 = vpop.permute.xlu1 %63  ;;  %v66_v34 = vpop.permute.xlu0 %65 }
  0x9a   :  { %v69_v35 = vadd.f32 %v64_v33, %v61_v31  ;;  %v70_v36 = vadd.f32 %v66_v34, %v62_v32 }
  0x9c   :  { %v85_v37 = vmul.f32 %v78_v22, %v69_v35  ;;  %v86_v38 = vmul.f32 %v83_v21, %v70_v36 }
  0x9e   :  { %88 = vst.msk [vmem:[%s151_s2] sm:$0xff] %vm87_vm0, %v85_v37  ;;  %89 = vst.msk [vmem:[%s151_s2 + $0x8] sm:$0xff] %vm87_vm0, %v86_v38 }

</bundles_post_ra>
